<compile_context>
chip_gen: v5e
topology: v5e:2x2
jax: 0.10.0
libtpu: 0.0.40
codegen_flags: <defaults>
</compile_context>

<pallas_src>
import functools

import jax
import jax.numpy as jnp
import numpy as np
from jax import lax
from jax.experimental import pallas as pl
from jax.experimental.pallas import tpu as pltpu

_LANES = 128


def _smooth_l1(diff, beta):
    ad = jnp.abs(diff)
    return jnp.where(ad < beta, 0.5 * diff * diff / beta, ad - 0.5 * beta)


def _round_up(x, m):
    return ((x + m - 1) // m) * m


def _tensorcores_per_chip():
    """Conservative TensorCore count: only v7-class chips report 2."""
    try:
        dev = jax.devices()[0]
        if getattr(dev, "platform", "") != "tpu":
            return 1
        kind = str(getattr(dev, "device_kind", "")).lower()
        if "v7" in kind or "7x" in kind:
            # TODO(synk): verify with xprof that the "parallel" split axis
            # actually shards across both TensorCores; if not, switch the
            # split axis to pltpu.CORE_PARALLEL / pl.core_map.
            return 2
    except Exception:
        pass
    return 1


# --------------------------------------------------------------------------
# Kernel 1: all small per-sample losses in one shot, from a packed slab.
#
# Packed column layout (f32, lanes 27..127 are zero padding):
#   0:3   Rot1 pred     3:6   Rot1 gt
#   6:9   Rot2 pred     9:12  Rot2 gt
#   12:15 Tran pred     15:18 Tran gt
#   18:21 Size pred     21:24 Size gt
#   24    Rot1_f        25    Rot2_f        26 sym flag
# --------------------------------------------------------------------------
def _small_losses_kernel(x_ref, out_ref, *, rot_1_w, rot_2_w, rot_regular,
                         tran_w, size_w, r_con_w):
    beta = 0.5
    x = x_ref[...]                                  # (bs, 128)
    bs_f = float(x.shape[0])

    r1p, r1g = x[:, 0:3], x[:, 3:6]
    r2p, r2g = x[:, 6:9], x[:, 9:12]
    tp, tg = x[:, 12:15], x[:, 15:18]
    sp, sg = x[:, 18:21], x[:, 21:24]
    r1f = x[:, 24:25]                               # (bs, 1)
    r2f = x[:, 25:26]
    symf = x[:, 26:27]

    # Rot1: mean over batch of per-sample SmoothL1 means == global mean.
    d1 = r1p - r1g
    rot1 = jnp.sum(_smooth_l1(d1, beta)) / (bs_f * 3.0)

    # Rot1_cos
    rot1_cos = jnp.sum(
        (1.0 - jnp.sum(r1p * r1g, axis=-1, keepdims=True)) * 2.0) / bs_f

    # Samples with sym == 1 are skipped for Rot2 / Rot2_cos / Rot_regular
    # (torch skips only sym == 1 there).
    valid_mask = jnp.where(symf != 1.0, 1.0, 0.0)   # (bs, 1)
    valid = jnp.sum(valid_mask)
    safe_valid = jnp.maximum(valid, 1.0)            # valid==0 -> sums are 0 anyway

    d2 = r2p - r2g
    per2 = jnp.sum(_smooth_l1(d2, beta), axis=-1, keepdims=True) / 3.0
    rot2 = jnp.sum(per2 * valid_mask) / safe_valid

    cos2 = (1.0 - jnp.sum(r2p * r2g, axis=-1, keepdims=True)) * 2.0
    rot2_cos = jnp.sum(cos2 * valid_mask) / safe_valid

    dots = jnp.abs(jnp.sum(r1p * r2p, axis=-1, keepdims=True))
    rot_ra = jnp.sum(dots * valid_mask) / safe_valid

    # Tran / Size: plain global SmoothL1 means.
    tran = jnp.sum(_smooth_l1(tp - tg, beta)) / (bs_f * 3.0)
    size = jnp.sum(_smooth_l1(sp - sg, beta)) / (bs_f * 3.0)

    # R_con
    dg2 = jnp.sum(d1 * d1, axis=-1, keepdims=True)          # ||dis_g||^2
    pg_gt = jnp.exp(-13.7 * dg2)
    res_g = jnp.sum(_smooth_l1(pg_gt - r1f, beta)) / bs_f

    # torch's res_r loop only includes samples with sym == 0 (not just != 1).
    zero_mask = jnp.where(symf == 0.0, 1.0, 0.0)             # (bs, 1)
    dr2 = jnp.sum(d2 * d2, axis=-1, keepdims=True)           # ||dis_r||^2
    pr_gt = jnp.exp(-13.7 * dr2)
    per_r = _smooth_l1(pr_gt - r2f, beta)
    res_r = jnp.sum(per_r * zero_mask) / bs_f                # divided by bs
    r_con = res_g + res_r

    out_ref[0] = rot_1_w * rot1
    out_ref[1] = rot_1_w * rot1_cos
    out_ref[2] = rot_2_w * rot2
    out_ref[3] = rot_2_w * rot2_cos
    out_ref[4] = rot_regular * rot_ra
    out_ref[5] = tran_w * tran
    out_ref[6] = size_w * size
    out_ref[7] = r_con_w * r_con


# --------------------------------------------------------------------------
# Kernel 2: tiled SmoothL1(beta=0.3) sum reduction for the reconstruction
# loss.  grid = (n_split [parallel], steps [arbitrary, reduction]).
# Accumulates into a persistent (8,128) VMEM scratch via chunked row-axis
# sums (bounded vreg live range); masks rows only on the final partial tile;
# writes one scalar per split to an SMEM output on the last step.
# --------------------------------------------------------------------------
def _recon_sum_kernel(p_ref, g_ref, out_ref, acc_ref, *, beta, rows,
                      tile_rows, chunk, steps_per_split, n_split, needs_mask):
    c = pl.program_id(0)
    i = pl.program_id(1)

    @pl.when(i == 0)
    def _():
        acc_ref[...] = jnp.zeros_like(acc_ref)

    n_chunks = tile_rows // chunk

    def tile_sum(mask_rows):
        def body(r, acc):
            off = pl.multiple_of(r * chunk, chunk)
            d = (p_ref[pl.ds(off, chunk), :].astype(jnp.float32)
                 - g_ref[pl.ds(off, chunk), :].astype(jnp.float32))
            v = _smooth_l1(d, beta)
            if mask_rows:
                # Row mask (select form; never multiply-by-mask -> no NaN leak).
                row0 = (c * steps_per_split + i) * tile_rows + off
                ridx = row0 + lax.broadcasted_iota(jnp.int32, v.shape, 0)
                v = jnp.where(ridx < rows, v, 0.0)
            # Sum only across vreg rows (same lane/sublane) -> pure VPU adds.
            return acc + v.reshape(-1, 8, _LANES).sum(axis=0)
        return lax.fori_loop(0, n_chunks, body,
                             jnp.zeros((8, _LANES), jnp.float32), unroll=True)

    if needs_mask:
        is_last = jnp.logical_and(c == n_split - 1, i == steps_per_split - 1)

        @pl.when(is_last)
        def _():
            acc_ref[...] += tile_sum(True)

        @pl.when(jnp.logical_not(is_last))
        def _():
            acc_ref[...] += tile_sum(False)
    else:
        acc_ref[...] += tile_sum(False)

    @pl.when(i == steps_per_split - 1)
    def _():
        out_ref[c] = jnp.sum(acc_ref[...])


def _recon_loss(pred, gt, *, beta=0.3, recon_w=8.0, tile_rows=2048):
    total = int(pred.size)
    p = pred.reshape(-1)
    g = gt.reshape(-1)
    rows = total // _LANES
    tail = total - rows * _LANES

    tail_sum = jnp.float32(0.0)
    if tail:
        # <128-element ragged tail computed on a tiny slice in plain JAX
        # (no full-tensor host-side pad).
        tail_sum = jnp.sum(_smooth_l1(
            p[rows * _LANES:].astype(jnp.float32)
            - g[rows * _LANES:].astype(jnp.float32), beta))
        # TODO(synk): a manual-DMA path (memory_space=pl.ANY) would also avoid
        # materializing this aligned-prefix slice.
        p = p[: rows * _LANES]
        g = g[: rows * _LANES]

    if rows == 0:
        return recon_w * tail_sum / total

    p2 = p.reshape(rows, _LANES)   # native dtype; upcast happens in-kernel
    g2 = g.reshape(rows, _LANES)

    # Sublane granularity: 8 rows for 4-byte dtypes, 16 for 2-byte (bf16).
    sub = 16 if p2.dtype.itemsize == 2 else 8
    tr = min(_round_up(tile_rows, sub), _round_up(rows, sub))
    chunk = next(csz for csz in (128, 64, 32, 16, 8)
                 if csz % sub == 0 and tr % csz == 0)

    steps_total = -(-rows // tr)
    n_split = (2 if (_tensorcores_per_chip() >= 2 and steps_total >= 2
                     and steps_total % 2 == 0) else 1)
    sps = steps_total // n_split
    needs_mask = (steps_total * tr) != rows   # only the final tile is partial

    kern = functools.partial(
        _recon_sum_kernel, beta=beta, rows=rows, tile_rows=tr, chunk=chunk,
        steps_per_split=sps, n_split=n_split, needs_mask=needs_mask)

    # VMEM: 2 inputs x 2 buffers x (tr*128*itemsize) <= ~4 MiB for f32 at
    # tr=2048 -> well under every generation's scoped-VMEM default.
    part = pl.pallas_call(
        kern,
        out_shape=jax.ShapeDtypeStruct((n_split,), jnp.float32),
        grid=(n_split, sps),
        in_specs=[pl.BlockSpec((tr, _LANES), lambda c, i: (c * sps + i, 0)),
                  pl.BlockSpec((tr, _LANES), lambda c, i: (c * sps + i, 0))],
        out_specs=pl.BlockSpec(memory_space=pltpu.MemorySpace.SMEM),
        scratch_shapes=[pltpu.VMEM((8, _LANES), jnp.float32)],
        compiler_params=pltpu.CompilerParams(
            dimension_semantics=("parallel", "arbitrary")),
    )(p2, g2)

    return recon_w * (jnp.sum(part) + tail_sum) / total


class FSNetLossFullPallas:
    """JAX/Pallas port of fs_net_loss_full (fsnet_loss_type='smoothl1')."""

    def __init__(self, fsnet_loss_type='smoothl1', rot_1_w=8.0, rot_2_w=8.0,
                 rot_regular=4.0, recon_w=8.0, tran_w=8.0, size_w=8.0,
                 r_con_w=1.0):
        if fsnet_loss_type != 'smoothl1':
            raise NotImplementedError
        self.rot_1_w = rot_1_w
        self.rot_2_w = rot_2_w
        self.rot_regular = rot_regular
        self.recon_w = recon_w
        self.tran_w = tran_w
        self.size_w = size_w
        self.r_con_w = r_con_w

    def _small_losses(self, pred_list, gt_list, sym):
        bs = pred_list['Rot1'].shape[0]
        f32 = lambda a: jnp.asarray(a, jnp.float32)
        packed = jnp.concatenate([
            f32(pred_list['Rot1']).reshape(bs, 3),
            f32(gt_list['Rot1']).reshape(bs, 3),
            f32(pred_list['Rot2']).reshape(bs, 3),
            f32(gt_list['Rot2']).reshape(bs, 3),
            f32(pred_list['Tran']).reshape(bs, 3),
            f32(gt_list['Tran']).reshape(bs, 3),
            f32(pred_list['Size']).reshape(bs, 3),
            f32(gt_list['Size']).reshape(bs, 3),
            f32(pred_list['Rot1_f']).reshape(bs, -1)[:, :1],
            f32(pred_list['Rot2_f']).reshape(bs, -1)[:, :1],
            f32(sym).reshape(bs, -1)[:, :1],
        ], axis=1)                                              # (bs, 27)
        packed = jnp.pad(packed, ((0, 0), (0, _LANES - packed.shape[1])))

        kern = functools.partial(
            _small_losses_kernel,
            rot_1_w=self.rot_1_w, rot_2_w=self.rot_2_w,
            rot_regular=self.rot_regular, tran_w=self.tran_w,
            size_w=self.size_w, r_con_w=self.r_con_w)
        return pl.pallas_call(
            kern,
            out_shape=jax.ShapeDtypeStruct((8,), jnp.float32),
            in_specs=[pl.BlockSpec(memory_space=pltpu.MemorySpace.VMEM)],
            out_specs=pl.BlockSpec(memory_space=pltpu.MemorySpace.SMEM),
        )(packed)

    def __call__(self, name_list, pred_list, gt_list, sym):
        small = self._small_losses(pred_list, gt_list, sym)
        loss_list = {}
        if 'Rot1' in name_list:
            loss_list['Rot1'] = small[0]
        if 'Rot1_cos' in name_list:
            loss_list['Rot1_cos'] = small[1]
        if 'Rot2' in name_list:
            loss_list['Rot2'] = small[2]
        if 'Rot2_cos' in name_list:
            loss_list['Rot2_cos'] = small[3]
        if 'Rot_regular' in name_list:
            loss_list['Rot_r_a'] = small[4]
        if 'Recon' in name_list:
            loss_list['Recon'] = _recon_loss(
                pred_list['Recon'], gt_list['Recon'],
                beta=0.3, recon_w=self.recon_w)
        if 'Tran' in name_list:
            loss_list['Tran'] = small[5]
        if 'Size' in name_list:
            loss_list['Size'] = small[6]
        if 'R_con' in name_list:
            loss_list['R_con'] = small[7]
        return loss_list


# --------------------------------------------------------------------------
# Pure-JAX reference that mirrors the torch per-sample loops exactly.
# --------------------------------------------------------------------------
def _ref_losses(pred, gt, sym, w):
    def sl1(x, beta):
        ax = jnp.abs(x)
        return jnp.mean(jnp.where(ax < beta, 0.5 * x * x / beta, ax - 0.5 * beta))

    sym_np = np.asarray(sym)
    bs = pred['Rot1'].shape[0]
    out = {}
    out['Rot1'] = w['rot1'] * jnp.mean(
        jnp.stack([sl1(pred['Rot1'][i] - gt['Rot1'][i], 0.5) for i in range(bs)]))
    out['Rot1_cos'] = w['rot1'] * jnp.mean(
        jnp.stack([(1.0 - jnp.sum(pred['Rot1'][i] * gt['Rot1'][i])) * 2.0
                   for i in range(bs)]))
    r2 = 0.0; c2 = 0.0; ra = 0.0; valid = 0.0
    for i in range(bs):
        if sym_np[i, 0] == 1:
            continue
        r2 = r2 + sl1(pred['Rot2'][i] - gt['Rot2'][i], 0.5)
        c2 = c2 + (1.0 - jnp.sum(pred['Rot2'][i] * gt['Rot2'][i])) * 2.0
        ra = ra + jnp.abs(jnp.dot(pred['Rot1'][i], pred['Rot2'][i]))
        valid += 1.0
    if valid > 0.0:
        r2, c2, ra = r2 / valid, c2 / valid, ra / valid
    out['Rot2'] = w['rot2'] * r2
    out['Rot2_cos'] = w['rot2'] * c2
    out['Rot_r_a'] = w['rot_reg'] * ra
    out['Recon'] = w['recon'] * sl1(pred['Recon'] - gt['Recon'], 0.3)
    out['Tran'] = w['tran'] * sl1(pred['Tran'] - gt['Tran'], 0.5)
    out['Size'] = w['size'] * sl1(pred['Size'] - gt['Size'], 0.5)
    dis_g = pred['Rot1'] - gt['Rot1']
    dgn = jnp.sqrt(jnp.sum(dis_g * dis_g, axis=-1))
    res_g = sl1(jnp.exp(-13.7 * dgn * dgn) - pred['Rot1_f'][:, 0], 0.5)
    res_r = 0.0
    for i in range(bs):
        if sym_np[i, 0] == 0:   # torch: only sym == 0 samples contribute
            dr = pred['Rot2'][i] - gt['Rot2'][i]
            drn = jnp.sqrt(jnp.sum(dr * dr))
            res_r = res_r + sl1(jnp.exp(-13.7 * drn * drn) - pred['Rot2_f'][i, 0], 0.5)
    out['R_con'] = w['rcon'] * (res_g + res_r / bs)
    return out


if __name__ == "__main__":
    key = jax.random.PRNGKey(0)
    ks = jax.random.split(key, 10)
    bs, npts = 2, 256

    def unit(v):
        return v / jnp.linalg.norm(v, axis=-1, keepdims=True)

    pred_list = {
        'Rot1': unit(jax.random.normal(ks[0], (bs, 3), jnp.float32)),
        'Rot2': unit(jax.random.normal(ks[1], (bs, 3), jnp.float32)),
        'Rot1_f': jax.nn.sigmoid(jax.random.normal(ks[2], (bs, 1), jnp.float32)),
        'Rot2_f': jax.nn.sigmoid(jax.random.normal(ks[3], (bs, 1), jnp.float32)),
        'Recon': jax.random.normal(ks[4], (bs, npts, 3), jnp.float32),
        'Tran': jax.random.normal(ks[5], (bs, 3), jnp.float32),
        'Size': jax.random.normal(ks[6], (bs, 3), jnp.float32),
    }
    gt_list = {
        'Rot1': unit(jax.random.normal(ks[7], (bs, 3), jnp.float32)),
        'Rot2': unit(jax.random.normal(ks[8], (bs, 3), jnp.float32)),
        'Recon': pred_list['Recon'] + 0.1 * jax.random.normal(ks[9], (bs, npts, 3), jnp.float32),
        'Tran': pred_list['Tran'] + 0.2,
        'Size': pred_list['Size'] - 0.3,
    }
    sym = jnp.array([[0], [1]], dtype=jnp.int32)   # one asymmetric, one symmetric

    name_list = ['Rot1', 'Rot1_cos', 'Rot2', 'Rot2_cos', 'Rot_regular',
                 'Recon', 'Tran', 'Size', 'R_con']

    loss_mod = FSNetLossFullPallas()
    losses = loss_mod(name_list, pred_list, gt_list, sym)
    losses = jax.tree_util.tree_map(jax.block_until_ready, losses)

    ref = _ref_losses(pred_list, gt_list, sym,
                      dict(rot1=8.0, rot2=8.0, rot_reg=4.0, recon=8.0,
                           tran=8.0, size=8.0, rcon=1.0))
    for k in losses:
        np.testing.assert_allclose(np.asarray(losses[k]), np.asarray(ref[k]),
                                   rtol=1e-4, atol=1e-5)

    # Extra check: ragged (non-multiple-of-128) recon size exercises the
    # no-host-pad tail path.
    pr = jax.random.normal(jax.random.PRNGKey(1), (2, 175, 3), jnp.float32)
    gr = pr + 0.05 * jax.random.normal(jax.random.PRNGKey(2), (2, 175, 3), jnp.float32)
    recon_ragged = jax.block_until_ready(_recon_loss(pr, gr, beta=0.3, recon_w=8.0))
    dd = pr - gr
    add = jnp.abs(dd)
    ref_ragged = 8.0 * jnp.mean(jnp.where(add < 0.3, 0.5 * dd * dd / 0.3, add - 0.15))
    np.testing.assert_allclose(np.asarray(recon_ragged), np.asarray(ref_ragged),
                               rtol=1e-4, atol=1e-5)

    print("KERNEL_OK")
</pallas_src>

<mosaic_0001>
module attributes {stable_mosaic.version = 11 : i64} {
  func.func @_small_losses_kernel(%arg0: memref<2x128xf32, #tpu.memory_space<vmem>>, %arg1: memref<8xf32, #tpu.memory_space<smem>>) attributes {dimension_semantics = [], scalar_prefetch = 0 : i64, scratch_operands = 0 : i64, tpu.core_type = #tpu.core_type<tc>} {
    %c0 = arith.constant 0 : index
    %c0_0 = arith.constant 0 : index
    %0 = vector.load %arg0[%c0, %c0_0] : memref<2x128xf32, #tpu.memory_space<vmem>>, vector<2x128xf32>
    %1 = vector.extract_strided_slice %0 {offsets = [0, 0], sizes = [2, 3], strides = [1, 1]} : vector<2x128xf32> to vector<2x3xf32>
    %2 = vector.extract_strided_slice %0 {offsets = [0, 3], sizes = [2, 3], strides = [1, 1]} : vector<2x128xf32> to vector<2x3xf32>
    %3 = vector.extract_strided_slice %0 {offsets = [0, 6], sizes = [2, 3], strides = [1, 1]} : vector<2x128xf32> to vector<2x3xf32>
    %4 = vector.extract_strided_slice %0 {offsets = [0, 9], sizes = [2, 3], strides = [1, 1]} : vector<2x128xf32> to vector<2x3xf32>
    %5 = vector.extract_strided_slice %0 {offsets = [0, 12], sizes = [2, 3], strides = [1, 1]} : vector<2x128xf32> to vector<2x3xf32>
    %6 = vector.extract_strided_slice %0 {offsets = [0, 15], sizes = [2, 3], strides = [1, 1]} : vector<2x128xf32> to vector<2x3xf32>
    %7 = vector.extract_strided_slice %0 {offsets = [0, 18], sizes = [2, 3], strides = [1, 1]} : vector<2x128xf32> to vector<2x3xf32>
    %8 = vector.extract_strided_slice %0 {offsets = [0, 21], sizes = [2, 3], strides = [1, 1]} : vector<2x128xf32> to vector<2x3xf32>
    %9 = vector.extract_strided_slice %0 {offsets = [0, 24], sizes = [2, 1], strides = [1, 1]} : vector<2x128xf32> to vector<2x1xf32>
    %10 = vector.extract_strided_slice %0 {offsets = [0, 25], sizes = [2, 1], strides = [1, 1]} : vector<2x128xf32> to vector<2x1xf32>
    %11 = vector.extract_strided_slice %0 {offsets = [0, 26], sizes = [2, 1], strides = [1, 1]} : vector<2x128xf32> to vector<2x1xf32>
    %12 = arith.subf %1, %2 : vector<2x3xf32>
    %13 = math.absf %12 : vector<2x3xf32>
    %cst = arith.constant 5.000000e-01 : f32
    %14 = vector.broadcast %cst : f32 to vector<2x3xf32>
    %15 = arith.cmpf olt, %13, %14 : vector<2x3xf32>
    %cst_1 = arith.constant 5.000000e-01 : f32
    %16 = vector.broadcast %cst_1 : f32 to vector<2x3xf32>
    %17 = arith.mulf %16, %12 : vector<2x3xf32>
    %18 = arith.mulf %17, %12 : vector<2x3xf32>
    %cst_2 = arith.constant 5.000000e-01 : f32
    %19 = vector.broadcast %cst_2 : f32 to vector<2x3xf32>
    %20 = arith.divf %18, %19 : vector<2x3xf32>
    %cst_3 = arith.constant 2.500000e-01 : f32
    %21 = vector.broadcast %cst_3 : f32 to vector<2x3xf32>
    %22 = arith.subf %13, %21 : vector<2x3xf32>
    %23 = arith.select %15, %20, %22 : vector<2x3xi1>, vector<2x3xf32>
    %24 = vector.shape_cast %23 : vector<2x3xf32> to vector<1x2x3xf32>
    %cst_4 = arith.constant dense<0.000000e+00> : vector<1xf32>
    %25 = vector.multi_reduction <add>, %24, %cst_4 [1, 2] : vector<1x2x3xf32> to vector<1xf32>
    %26 = vector.shape_cast %25 : vector<1xf32> to vector<1x1x1xf32>
    %27 = vector.extract %26[0, 0, 0] : f32 from vector<1x1x1xf32>
    %cst_5 = arith.constant 6.000000e+00 : f32
    %28 = arith.divf %27, %cst_5 : f32
    %29 = arith.mulf %1, %2 : vector<2x3xf32>
    %cst_6 = arith.constant dense<0.000000e+00> : vector<2xf32>
    %30 = vector.multi_reduction <add>, %29, %cst_6 [1] : vector<2x3xf32> to vector<2xf32>
    %31 = vector.shape_cast %30 : vector<2xf32> to vector<2x1xf32>
    %cst_7 = arith.constant 1.000000e+00 : f32
    %32 = vector.broadcast %cst_7 : f32 to vector<2x1xf32>
    %33 = arith.subf %32, %31 : vector<2x1xf32>
    %cst_8 = arith.constant 2.000000e+00 : f32
    %34 = vector.broadcast %cst_8 : f32 to vector<2x1xf32>
    %35 = arith.mulf %33, %34 : vector<2x1xf32>
    %36 = vector.shape_cast %35 : vector<2x1xf32> to vector<1x2x1xf32>
    %cst_9 = arith.constant dense<0.000000e+00> : vector<1xf32>
    %37 = vector.multi_reduction <add>, %36, %cst_9 [1, 2] : vector<1x2x1xf32> to vector<1xf32>
    %38 = vector.shape_cast %37 : vector<1xf32> to vector<1x1x1xf32>
    %39 = vector.extract %38[0, 0, 0] : f32 from vector<1x1x1xf32>
    %cst_10 = arith.constant 2.000000e+00 : f32
    %40 = arith.divf %39, %cst_10 : f32
    %cst_11 = arith.constant 1.000000e+00 : f32
    %41 = vector.broadcast %cst_11 : f32 to vector<2x1xf32>
    %42 = arith.cmpf one, %11, %41 : vector<2x1xf32>
    %cst_12 = arith.constant 1.000000e+00 : f32
    %cst_13 = arith.constant 0.000000e+00 : f32
    %43 = vector.broadcast %cst_12 : f32 to vector<2x1xf32>
    %44 = vector.broadcast %cst_13 : f32 to vector<2x1xf32>
    %45 = arith.select %42, %43, %44 : vector<2x1xi1>, vector<2x1xf32>
    %46 = vector.shape_cast %45 : vector<2x1xf32> to vector<1x2x1xf32>
    %cst_14 = arith.constant dense<0.000000e+00> : vector<1xf32>
    %47 = vector.multi_reduction <add>, %46, %cst_14 [1, 2] : vector<1x2x1xf32> to vector<1xf32>
    %48 = vector.shape_cast %47 : vector<1xf32> to vector<1x1x1xf32>
    %49 = vector.extract %48[0, 0, 0] : f32 from vector<1x1x1xf32>
    %cst_15 = arith.constant 1.000000e+00 : f32
    %50 = arith.maximumf %49, %cst_15 : f32
    %51 = arith.subf %3, %4 : vector<2x3xf32>
    %52 = math.absf %51 : vector<2x3xf32>
    %cst_16 = arith.constant 5.000000e-01 : f32
    %53 = vector.broadcast %cst_16 : f32 to vector<2x3xf32>
    %54 = arith.cmpf olt, %52, %53 : vector<2x3xf32>
    %cst_17 = arith.constant 5.000000e-01 : f32
    %55 = vector.broadcast %cst_17 : f32 to vector<2x3xf32>
    %56 = arith.mulf %55, %51 : vector<2x3xf32>
    %57 = arith.mulf %56, %51 : vector<2x3xf32>
    %cst_18 = arith.constant 5.000000e-01 : f32
    %58 = vector.broadcast %cst_18 : f32 to vector<2x3xf32>
    %59 = arith.divf %57, %58 : vector<2x3xf32>
    %cst_19 = arith.constant 2.500000e-01 : f32
    %60 = vector.broadcast %cst_19 : f32 to vector<2x3xf32>
    %61 = arith.subf %52, %60 : vector<2x3xf32>
    %62 = arith.select %54, %59, %61 : vector<2x3xi1>, vector<2x3xf32>
    %cst_20 = arith.constant dense<0.000000e+00> : vector<2xf32>
    %63 = vector.multi_reduction <add>, %62, %cst_20 [1] : vector<2x3xf32> to vector<2xf32>
    %64 = vector.shape_cast %63 : vector<2xf32> to vector<2x1xf32>
    %cst_21 = arith.constant 3.000000e+00 : f32
    %65 = vector.broadcast %cst_21 : f32 to vector<2x1xf32>
    %66 = arith.divf %64, %65 : vector<2x1xf32>
    %67 = arith.mulf %66, %45 : vector<2x1xf32>
    %68 = vector.shape_cast %67 : vector<2x1xf32> to vector<1x2x1xf32>
    %cst_22 = arith.constant dense<0.000000e+00> : vector<1xf32>
    %69 = vector.multi_reduction <add>, %68, %cst_22 [1, 2] : vector<1x2x1xf32> to vector<1xf32>
    %70 = vector.shape_cast %69 : vector<1xf32> to vector<1x1x1xf32>
    %71 = vector.extract %70[0, 0, 0] : f32 from vector<1x1x1xf32>
    %72 = arith.divf %71, %50 : f32
    %73 = arith.mulf %3, %4 : vector<2x3xf32>
    %cst_23 = arith.constant dense<0.000000e+00> : vector<2xf32>
    %74 = vector.multi_reduction <add>, %73, %cst_23 [1] : vector<2x3xf32> to vector<2xf32>
    %75 = vector.shape_cast %74 : vector<2xf32> to vector<2x1xf32>
    %cst_24 = arith.constant 1.000000e+00 : f32
    %76 = vector.broadcast %cst_24 : f32 to vector<2x1xf32>
    %77 = arith.subf %76, %75 : vector<2x1xf32>
    %cst_25 = arith.constant 2.000000e+00 : f32
    %78 = vector.broadcast %cst_25 : f32 to vector<2x1xf32>
    %79 = arith.mulf %77, %78 : vector<2x1xf32>
    %80 = arith.mulf %79, %45 : vector<2x1xf32>
    %81 = vector.shape_cast %80 : vector<2x1xf32> to vector<1x2x1xf32>
    %cst_26 = arith.constant dense<0.000000e+00> : vector<1xf32>
    %82 = vector.multi_reduction <add>, %81, %cst_26 [1, 2] : vector<1x2x1xf32> to vector<1xf32>
    %83 = vector.shape_cast %82 : vector<1xf32> to vector<1x1x1xf32>
    %84 = vector.extract %83[0, 0, 0] : f32 from vector<1x1x1xf32>
    %85 = arith.divf %84, %50 : f32
    %86 = arith.mulf %1, %3 : vector<2x3xf32>
    %cst_27 = arith.constant dense<0.000000e+00> : vector<2xf32>
    %87 = vector.multi_reduction <add>, %86, %cst_27 [1] : vector<2x3xf32> to vector<2xf32>
    %88 = vector.shape_cast %87 : vector<2xf32> to vector<2x1xf32>
    %89 = math.absf %88 : vector<2x1xf32>
    %90 = arith.mulf %89, %45 : vector<2x1xf32>
    %91 = vector.shape_cast %90 : vector<2x1xf32> to vector<1x2x1xf32>
    %cst_28 = arith.constant dense<0.000000e+00> : vector<1xf32>
    %92 = vector.multi_reduction <add>, %91, %cst_28 [1, 2] : vector<1x2x1xf32> to vector<1xf32>
    %93 = vector.shape_cast %92 : vector<1xf32> to vector<1x1x1xf32>
    %94 = vector.extract %93[0, 0, 0] : f32 from vector<1x1x1xf32>
    %95 = arith.divf %94, %50 : f32
    %96 = arith.subf %5, %6 : vector<2x3xf32>
    %97 = math.absf %96 : vector<2x3xf32>
    %cst_29 = arith.constant 5.000000e-01 : f32
    %98 = vector.broadcast %cst_29 : f32 to vector<2x3xf32>
    %99 = arith.cmpf olt, %97, %98 : vector<2x3xf32>
    %cst_30 = arith.constant 5.000000e-01 : f32
    %100 = vector.broadcast %cst_30 : f32 to vector<2x3xf32>
    %101 = arith.mulf %100, %96 : vector<2x3xf32>
    %102 = arith.mulf %101, %96 : vector<2x3xf32>
    %cst_31 = arith.constant 5.000000e-01 : f32
    %103 = vector.broadcast %cst_31 : f32 to vector<2x3xf32>
    %104 = arith.divf %102, %103 : vector<2x3xf32>
    %cst_32 = arith.constant 2.500000e-01 : f32
    %105 = vector.broadcast %cst_32 : f32 to vector<2x3xf32>
    %106 = arith.subf %97, %105 : vector<2x3xf32>
    %107 = arith.select %99, %104, %106 : vector<2x3xi1>, vector<2x3xf32>
    %108 = vector.shape_cast %107 : vector<2x3xf32> to vector<1x2x3xf32>
    %cst_33 = arith.constant dense<0.000000e+00> : vector<1xf32>
    %109 = vector.multi_reduction <add>, %108, %cst_33 [1, 2] : vector<1x2x3xf32> to vector<1xf32>
    %110 = vector.shape_cast %109 : vector<1xf32> to vector<1x1x1xf32>
    %111 = vector.extract %110[0, 0, 0] : f32 from vector<1x1x1xf32>
    %cst_34 = arith.constant 6.000000e+00 : f32
    %112 = arith.divf %111, %cst_34 : f32
    %113 = arith.subf %7, %8 : vector<2x3xf32>
    %114 = math.absf %113 : vector<2x3xf32>
    %cst_35 = arith.constant 5.000000e-01 : f32
    %115 = vector.broadcast %cst_35 : f32 to vector<2x3xf32>
    %116 = arith.cmpf olt, %114, %115 : vector<2x3xf32>
    %cst_36 = arith.constant 5.000000e-01 : f32
    %117 = vector.broadcast %cst_36 : f32 to vector<2x3xf32>
    %118 = arith.mulf %117, %113 : vector<2x3xf32>
    %119 = arith.mulf %118, %113 : vector<2x3xf32>
    %cst_37 = arith.constant 5.000000e-01 : f32
    %120 = vector.broadcast %cst_37 : f32 to vector<2x3xf32>
    %121 = arith.divf %119, %120 : vector<2x3xf32>
    %cst_38 = arith.constant 2.500000e-01 : f32
    %122 = vector.broadcast %cst_38 : f32 to vector<2x3xf32>
    %123 = arith.subf %114, %122 : vector<2x3xf32>
    %124 = arith.select %116, %121, %123 : vector<2x3xi1>, vector<2x3xf32>
    %125 = vector.shape_cast %124 : vector<2x3xf32> to vector<1x2x3xf32>
    %cst_39 = arith.constant dense<0.000000e+00> : vector<1xf32>
    %126 = vector.multi_reduction <add>, %125, %cst_39 [1, 2] : vector<1x2x3xf32> to vector<1xf32>
    %127 = vector.shape_cast %126 : vector<1xf32> to vector<1x1x1xf32>
    %128 = vector.extract %127[0, 0, 0] : f32 from vector<1x1x1xf32>
    %cst_40 = arith.constant 6.000000e+00 : f32
    %129 = arith.divf %128, %cst_40 : f32
    %130 = arith.mulf %12, %12 : vector<2x3xf32>
    %cst_41 = arith.constant dense<0.000000e+00> : vector<2xf32>
    %131 = vector.multi_reduction <add>, %130, %cst_41 [1] : vector<2x3xf32> to vector<2xf32>
    %132 = vector.shape_cast %131 : vector<2xf32> to vector<2x1xf32>
    %cst_42 = arith.constant -1.370000e+01 : f32
    %133 = vector.broadcast %cst_42 : f32 to vector<2x1xf32>
    %134 = arith.mulf %133, %132 : vector<2x1xf32>
    %135 = math.exp %134 : vector<2x1xf32>
    %136 = arith.subf %135, %9 : vector<2x1xf32>
    %137 = math.absf %136 : vector<2x1xf32>
    %cst_43 = arith.constant 5.000000e-01 : f32
    %138 = vector.broadcast %cst_43 : f32 to vector<2x1xf32>
    %139 = arith.cmpf olt, %137, %138 : vector<2x1xf32>
    %cst_44 = arith.constant 5.000000e-01 : f32
    %140 = vector.broadcast %cst_44 : f32 to vector<2x1xf32>
    %141 = arith.mulf %140, %136 : vector<2x1xf32>
    %142 = arith.mulf %141, %136 : vector<2x1xf32>
    %cst_45 = arith.constant 5.000000e-01 : f32
    %143 = vector.broadcast %cst_45 : f32 to vector<2x1xf32>
    %144 = arith.divf %142, %143 : vector<2x1xf32>
    %cst_46 = arith.constant 2.500000e-01 : f32
    %145 = vector.broadcast %cst_46 : f32 to vector<2x1xf32>
    %146 = arith.subf %137, %145 : vector<2x1xf32>
    %147 = arith.select %139, %144, %146 : vector<2x1xi1>, vector<2x1xf32>
    %148 = vector.shape_cast %147 : vector<2x1xf32> to vector<1x2x1xf32>
    %cst_47 = arith.constant dense<0.000000e+00> : vector<1xf32>
    %149 = vector.multi_reduction <add>, %148, %cst_47 [1, 2] : vector<1x2x1xf32> to vector<1xf32>
    %150 = vector.shape_cast %149 : vector<1xf32> to vector<1x1x1xf32>
    %151 = vector.extract %150[0, 0, 0] : f32 from vector<1x1x1xf32>
    %cst_48 = arith.constant 2.000000e+00 : f32
    %152 = arith.divf %151, %cst_48 : f32
    %cst_49 = arith.constant 0.000000e+00 : f32
    %153 = vector.broadcast %cst_49 : f32 to vector<2x1xf32>
    %154 = arith.cmpf oeq, %11, %153 : vector<2x1xf32>
    %cst_50 = arith.constant 1.000000e+00 : f32
    %cst_51 = arith.constant 0.000000e+00 : f32
    %155 = vector.broadcast %cst_50 : f32 to vector<2x1xf32>
    %156 = vector.broadcast %cst_51 : f32 to vector<2x1xf32>
    %157 = arith.select %154, %155, %156 : vector<2x1xi1>, vector<2x1xf32>
    %158 = arith.mulf %51, %51 : vector<2x3xf32>
    %cst_52 = arith.constant dense<0.000000e+00> : vector<2xf32>
    %159 = vector.multi_reduction <add>, %158, %cst_52 [1] : vector<2x3xf32> to vector<2xf32>
    %160 = vector.shape_cast %159 : vector<2xf32> to vector<2x1xf32>
    %cst_53 = arith.constant -1.370000e+01 : f32
    %161 = vector.broadcast %cst_53 : f32 to vector<2x1xf32>
    %162 = arith.mulf %161, %160 : vector<2x1xf32>
    %163 = math.exp %162 : vector<2x1xf32>
    %164 = arith.subf %163, %10 : vector<2x1xf32>
    %165 = math.absf %164 : vector<2x1xf32>
    %cst_54 = arith.constant 5.000000e-01 : f32
    %166 = vector.broadcast %cst_54 : f32 to vector<2x1xf32>
    %167 = arith.cmpf olt, %165, %166 : vector<2x1xf32>
    %cst_55 = arith.constant 5.000000e-01 : f32
    %168 = vector.broadcast %cst_55 : f32 to vector<2x1xf32>
    %169 = arith.mulf %168, %164 : vector<2x1xf32>
    %170 = arith.mulf %169, %164 : vector<2x1xf32>
    %cst_56 = arith.constant 5.000000e-01 : f32
    %171 = vector.broadcast %cst_56 : f32 to vector<2x1xf32>
    %172 = arith.divf %170, %171 : vector<2x1xf32>
    %cst_57 = arith.constant 2.500000e-01 : f32
    %173 = vector.broadcast %cst_57 : f32 to vector<2x1xf32>
    %174 = arith.subf %165, %173 : vector<2x1xf32>
    %175 = arith.select %167, %172, %174 : vector<2x1xi1>, vector<2x1xf32>
    %176 = arith.mulf %175, %157 : vector<2x1xf32>
    %177 = vector.shape_cast %176 : vector<2x1xf32> to vector<1x2x1xf32>
    %cst_58 = arith.constant dense<0.000000e+00> : vector<1xf32>
    %178 = vector.multi_reduction <add>, %177, %cst_58 [1, 2] : vector<1x2x1xf32> to vector<1xf32>
    %179 = vector.shape_cast %178 : vector<1xf32> to vector<1x1x1xf32>
    %180 = vector.extract %179[0, 0, 0] : f32 from vector<1x1x1xf32>
    %cst_59 = arith.constant 2.000000e+00 : f32
    %181 = arith.divf %180, %cst_59 : f32
    %182 = arith.addf %152, %181 : f32
    %cst_60 = arith.constant 8.000000e+00 : f32
    %183 = arith.mulf %cst_60, %28 : f32
    %c0_61 = arith.constant 0 : index
    %184 = memref.load %arg1[%c0_61] : memref<8xf32, #tpu.memory_space<smem>>
    memref.store %183, %arg1[%c0_61] : memref<8xf32, #tpu.memory_space<smem>>
    %cst_62 = arith.constant 8.000000e+00 : f32
    %185 = arith.mulf %cst_62, %40 : f32
    %c1 = arith.constant 1 : index
    %186 = memref.load %arg1[%c1] : memref<8xf32, #tpu.memory_space<smem>>
    memref.store %185, %arg1[%c1] : memref<8xf32, #tpu.memory_space<smem>>
    %cst_63 = arith.constant 8.000000e+00 : f32
    %187 = arith.mulf %cst_63, %72 : f32
    %c2 = arith.constant 2 : index
    %188 = memref.load %arg1[%c2] : memref<8xf32, #tpu.memory_space<smem>>
    memref.store %187, %arg1[%c2] : memref<8xf32, #tpu.memory_space<smem>>
    %cst_64 = arith.constant 8.000000e+00 : f32
    %189 = arith.mulf %cst_64, %85 : f32
    %c3 = arith.constant 3 : index
    %190 = memref.load %arg1[%c3] : memref<8xf32, #tpu.memory_space<smem>>
    memref.store %189, %arg1[%c3] : memref<8xf32, #tpu.memory_space<smem>>
    %cst_65 = arith.constant 4.000000e+00 : f32
    %191 = arith.mulf %cst_65, %95 : f32
    %c4 = arith.constant 4 : index
    %192 = memref.load %arg1[%c4] : memref<8xf32, #tpu.memory_space<smem>>
    memref.store %191, %arg1[%c4] : memref<8xf32, #tpu.memory_space<smem>>
    %cst_66 = arith.constant 8.000000e+00 : f32
    %193 = arith.mulf %cst_66, %112 : f32
    %c5 = arith.constant 5 : index
    %194 = memref.load %arg1[%c5] : memref<8xf32, #tpu.memory_space<smem>>
    memref.store %193, %arg1[%c5] : memref<8xf32, #tpu.memory_space<smem>>
    %cst_67 = arith.constant 8.000000e+00 : f32
    %195 = arith.mulf %cst_67, %129 : f32
    %c6 = arith.constant 6 : index
    %196 = memref.load %arg1[%c6] : memref<8xf32, #tpu.memory_space<smem>>
    memref.store %195, %arg1[%c6] : memref<8xf32, #tpu.memory_space<smem>>
    %cst_68 = arith.constant 1.000000e+00 : f32
    %197 = arith.mulf %cst_68, %182 : f32
    %c7 = arith.constant 7 : index
    %198 = memref.load %arg1[%c7] : memref<8xf32, #tpu.memory_space<smem>>
    memref.store %197, %arg1[%c7] : memref<8xf32, #tpu.memory_space<smem>>
    return
  }
}

</mosaic_0001>

<bundles_post_ra>
// kernel: tpu_custom_call.1
= control target key start
LH: loop header
LB: loop body
LE: loop exit
PB: predicated region body
PF: predicated region fallthrough
CT: control target
= control target key end

     0   :  { %6 = vsyncpa [#allocation3], 0  ;;  %s601_s0 = inlined_call_operand.hbm [shape: f32[2,128], index: 0, kind: input, shape index: {}]   ;;  %s602_s1 = inlined_call_operand.hbm [shape: f32[8], index: 1, kind: output, shape index: {}]  }
   0x1   :  { %7 = vsyncpa [#allocation4], 0  ;;  %s13_s8 = sshll.u32 %s601_s0, 4  ;;  %s503_s9 = smov [#allocation2]   ;;  %s14_s8 = int_to_ptr.hbm [resolvable:$true] %s13_s8 }
   0x2   :  { %s15_s10 = sshll.u32 %s503_s9, 4  ;;  %s16_s10 = int_to_ptr.vmem [resolvable:$true] %s15_s10 }
   0x3   :  { %18 = dma.hbm_to_vmem [thread:$0]  %s14_s8, 32, %s16_s10, [#allocation3]  }
   0x4   :  { %499 = dma.done.wait [#allocation3], 32  }
   0x5   :  { %500 = vsyncadd [#allocation3], 4294967264  ;;  %v532_v0 = vld [vmem:[#allocation2] sm:$0x3]  ;;  %s504_s11 = smov 125   ;;  %s505_s12 = smov 122  }
   0x6   :  { %25 = vrot.lane.b32.xlu0 %v532_v0, %s504_s11  ;;  %vm89_vm0 = vcmp.ne.f32.partialorder %v532_v0, 1.0  ;;  %194 = vrot.lane.b32.xlu1 %v532_v0, %s505_s12  ;;  %v506_v1 = vmov 0.0   ;;  %s507_s0 = smov 102   ;;  %vm69_vm1 = vcmask 1024   ;;  %v508_v5 = vmov 0.5   ;;  %s510_s13 = smov 127  }
   0x7   :  { %v538_v2 = vsel %vm89_vm0, 1.0, %v506_v1  ;;  %449 = vrcp.f32 %v508_v5  ;;  %vm43_vm3 = vcmask 17408   ;;  %v509_v29 = vmov 6.0   ;;  %s512_s18 = smov 110   ;;  %s513_s19 = smov 116  }
   0x8   :  { %92 = vrot.lane.b32.xlu2 %v538_v2, %s507_s0  ;;  %451 = vrcp.f32 %v509_v29  ;;  %vm316_vm5 = vcmp.eq.f32.partialorder %v532_v0, 0.0  ;;  %v511_v52 = vmov 3.0   ;;  %s514_s20 = smov 104   ;;  %s515_s21 = smov 103  }
   0x9   :  { %v317_v43 = vsel %vm316_vm5, 1.0, %v506_v1  ;;  %453 = vrcp.f32 %v511_v52  ;;  %s517_s27 = smov 1.0  }
   0xd   :  { %v450_v6 = vpop.eup %449 }
   0xe   :  { %v34_v7 = vmul.f32 0.5, %v450_v6  ;;  %vm38_vm2 = vweird.f32 %v450_v6  ;;  %v452_v32 = vpop.eup %451 }
   0xf   :  { %v55_v35 = vmul.f32 6.0, %v452_v32  ;;  %vm59_vm6 = vweird.f32 %v452_v32  ;;  %v454_v53 = vpop.eup %453 }
  0x10   :  { %v35_v8 = vsub.f32 1.0, %v34_v7  ;;  %v114_v54 = vmul.f32 3.0, %v454_v53  ;;  %vm118_vm7 = vweird.f32 %v454_v53 }
  0x11   :  { %v56_v37 = vsub.f32 1.0, %v55_v35 }
  0x12   :  { %v36_v9 = vmul.f32 %v450_v6, %v35_v8  ;;  %v115_v57 = vsub.f32 1.0, %v114_v54 }
  0x13   :  { %v57_v41 = vmul.f32 %v452_v32, %v56_v37 }
  0x14   :  { %v37_v11 = vadd.f32 %v450_v6, %v36_v9  ;;  %v116_v59 = vmul.f32 %v454_v53, %v115_v57 }
  0x15   :  { %v58_v45 = vadd.f32 %v452_v32, %v57_v41  ;;  %v516_v41 = vmov 2.0  }
  0x16   :  { %v546_v17 = vsel %vm38_vm2, %v450_v6, %v37_v11  ;;  %v117_v62 = vadd.f32 %v454_v53, %v116_v59 }
  0x17   :  { %v60_v48 = vsel %vm59_vm6, %v452_v32, %v58_v45 }
  0x62   :  { %v93_v3 = vpop.permute.xlu2 %92 }
  0x63   :  { %v95_v4 = vsel %vm69_vm1, %v93_v3, 0.0  ;;  %v119_v3 = vsel %vm118_vm7, %v454_v53, %v117_v62 }
  0x64   :  { %96 = vadd.xlane.f32.xlu2 %v95_v4 }
  0x78   :  { %v26_v10 = vpop.permute.xlu0 %25  ;;  %v195_v25 = vpop.permute.xlu1 %194 }
  0x79   :  { %v28_v12 = vsub.f32 %v532_v0, %v26_v10  ;;  %v63_v13 = vmul.f32 %v26_v10, %v532_v0  ;;  %v197_v26 = vmul.f32 %v195_v25, %v532_v0 }
  0x7b   :  { %v31_v14 = vmul.f32 0.5, %v28_v12  ;;  %154 = vrot.lane.b32.xlu1 %v63_v13, %s505_s12  ;;  %v278_v15 = vmul.f32 %v28_v12, %v28_v12  ;;  %v29_v16 = vand.u32 2147483647, %v28_v12  ;;  %v64_v24 = vsel %vm43_vm3, %v63_v13, 0.0 }
  0x7c   :  { %v198_v27 = vsel %vm43_vm3, %v197_v26, 0.0 }
  0x7d   :  { %v32_v18 = vmul.f32 %v31_v14, %v28_v12  ;;  %v279_v19 = vsel %vm43_vm3, %v278_v15, 0.0  ;;  %v404_v21 = vadd.f32 -0.25, %v29_v16  ;;  %vm30_vm4 = vcmp.lt.f32.partialorder %v29_v16, 0.5 }
  0x7e   :  { %280 = vadd.xlane.f32.xlu0 %v279_v19 }
  0x7f   :  { %v40_v20 = vmul.f32 %v546_v17, %v32_v18 }
  0x81   :  { %v550_v22 = vsel %vm30_vm4, %v40_v20, %v404_v21 }
  0x82   :  { %107 = vrot.lane.b32.xlu2 %v550_v22, %s505_s12  ;;  %v44_v23 = vsel %vm43_vm3, %v550_v22, 0.0 }
  0x86   :  { %45 = vadd.xlane.f32.xlu0 %v44_v23 }
  0xa5   :  { %65 = vadd.xlane.f32.xlu1 %v64_v24 }
  0xbe   :  { %319 = vrot.lane.b32.xlu1 %v278_v15, %s505_s12 }
  0xd7   :  { %v560_v28 = vpop.xlane.xlu2 %96 }
  0xdf   :  { %v108_v34 = vpop.permute.xlu2 %107 }
  0xe0   :  { %v110_v36 = vsel %vm43_vm3, %v108_v34, 0.0 }
  0xe8   :  { %199 = vadd.xlane.f32.xlu1 %v198_v27 }
  0xed   :  { %v155_v30 = vpop.permute.xlu1 %154 }
  0xee   :  { %v157_v31 = vsel %vm43_vm3, %v155_v30, 0.0 }
  0xef   :  { %158 = vadd.xlane.f32.xlu0 %v157_v31 }
  0xf1   :  { %v281_v33 = vpop.xlane.xlu0 %280 }
  0xf2   :  { %v282_v7 = vmul.f32 -13.7, %v281_v33 }
  0xf4   :  { %v283_v9 = vmul.f32 1.442695, %v282_v7 }
  0xf6   :  { %455 = vpow2.f32 %v283_v9 }
  0xf7   :  { %111 = vadd.xlane.f32.xlu0 %v110_v36 }
  0xf9   :  { %v46_v38 = vpop.xlane.xlu0 %45 }
  0xfa   :  { %v47_v39 = vrot.slane %v46_v38, 4 }
  0xfc   :  { %v48_v40 = vadd.f32 %v47_v39, %v46_v38  ;;  %v456_v12 = vpop.eup %455 }
  0xfd   :  { %v285_v13 = vsub.f32 %v456_v12, %v532_v0 }
  0xfe   :  { %v49_v42 = vrot.slane %v48_v40, 2 }
  0xff   :  { %v286_v15 = vand.u32 2147483647, %v285_v13 }
 0x100   :  { %v50_v44 = vadd.f32 %v49_v42, %v48_v40 }
 0x101   :  { %337 = vrot.lane.b32.xlu1 %v317_v43, %s510_s13  ;;  %v405_v19 = vadd.f32 -0.25, %v286_v15  ;;  %vm287_vm8 = vcmp.lt.f32.partialorder %v286_v15, 0.5 }
 0x102   :  { %v51_v46 = vrot.slane %v50_v44, 1 }
 0x104   :  { %v52_v47 = vadd.f32 %v51_v46, %v50_v44  ;;  %v98_v44 = vrot.slane %v560_v28, 4 }
 0x106   :  { %407 = vpush %v52_v47  ;;  %v99_v46 = vadd.f32 %v98_v44, %v560_v28 }
 0x107   :  { %409 = vpush %v60_v48 }
 0x118   :  { %v66_v49 = vpop.xlane.xlu1 %65 }
 0x119   :  { %v67_v8 = vsub.f32 1.0, %v66_v49  ;;  %v100_v49 = vrot.slane %v99_v46, 2 }
 0x11b   :  { %v68_v10 = vmul.f32 2.0, %v67_v8  ;;  %v101_v54 = vadd.f32 %v100_v49, %v99_v46 }
 0x11d   :  { %v70_v11 = vsel %vm69_vm1, %v68_v10, 0.0 }
 0x130   :  { %v320_v50 = vpop.permute.xlu1 %319 }
 0x131   :  { %v322_v51 = vsel %vm43_vm3, %v320_v50, 0.0 }
 0x132   :  { %323 = vadd.xlane.f32.xlu1 %v322_v51 }
 0x137   :  { %s408_s14 = spop %407 }
 0x138   :  { %s566_s15 = spop %409 }
 0x139   :  { %s62_s16 = smul.f32 %s566_s15, %s408_s14 }
 0x13b   :  { %s365_s17 = smul.f32 8.0, %s62_s16 }
 0x13d   :  { %367 = sst [smem:[#allocation5]] %s365_s17 }
 0x15b   :  { %v200_v55 = vpop.xlane.xlu1 %199 }
 0x15c   :  { %v201_v56 = vand.u32 2147483647, %v200_v55 }
 0x15e   :  { %v202_v58 = vmul.f32 %v201_v56, %v538_v2 }
 0x160   :  { %204 = vrot.lane.b32.xlu1 %v202_v58, %s507_s0  ;;  %v102_v58 = vrot.slane %v101_v54, 1 }
 0x162   :  { %v159_v60 = vpop.xlane.xlu0 %158 }
 0x163   :  { %v160_v61 = vsub.f32 1.0, %v159_v60 }
 0x165   :  { %v161_v63 = vmul.f32 2.0, %v160_v61  ;;  %v103_v61 = vadd.f32 %v102_v58, %v101_v54 }
 0x167   :  { %v162_v1 = vmul.f32 %v161_v63, %v538_v2 }
 0x169   :  { %164 = vrot.lane.b32.xlu2 %v162_v1, %s507_s0 }
 0x16a   :  { %v112_v4 = vpop.xlane.xlu0 %111 }
 0x16b   :  { %v120_v5 = vmul.f32 %v119_v3, %v112_v4 }
 0x16d   :  { %v121_v6 = vmul.f32 %v120_v5, %v538_v2  ;;  %v288_v2 = vmul.f32 0.5, %v285_v13 }
 0x16f   :  { %123 = vrot.lane.b32.xlu0 %v121_v6, %s507_s0  ;;  %v289_v14 = vmul.f32 %v288_v2, %v285_v13 }
 0x171   :  { %256 = vrot.lane.b32.xlu2 %v550_v22, %s512_s18  ;;  %v290_v18 = vmul.f32 %v289_v14, %v546_v17 }
 0x173   :  { %v338_v16 = vpop.permute.xlu1 %337  ;;  %v292_v20 = vsel %vm287_vm8, %v290_v18, %v405_v19 }
 0x177   :  { %234 = vrot.lane.b32.xlu0 %v550_v22, %s513_s19  ;;  %s393_s19 = sshll.u32 %s602_s1, 4  ;;  %s394_s19 = int_to_ptr.hbm [resolvable:$true] %s393_s19 }
 0x18a   :  { %71 = vadd.xlane.f32.xlu1 %v70_v11 }
 0x1a3   :  { %294 = vrot.lane.b32.xlu1 %v292_v20, %s514_s20 }
 0x1a5   :  { %v324_v21 = vpop.xlane.xlu1 %323 }
 0x1a6   :  { %v325_v22 = vmul.f32 -13.7, %v324_v21 }
 0x1a8   :  { %v326_v23 = vmul.f32 1.442695, %v325_v22 }
 0x1aa   :  { %457 = vpow2.f32 %v326_v23 }
 0x1ab   :  { %459 = vrcp.f32 %v516_v41 }
 0x1b0   :  { %v458_v24 = vpop.eup %457 }
 0x1b1   :  { %v328_v25 = vsub.f32 %v458_v24, %v532_v0  ;;  %v460_v43 = vpop.eup %459 }
 0x1b2   :  { %v81_v45 = vmul.f32 2.0, %v460_v43  ;;  %vm85_vm10 = vweird.f32 %v460_v43 }
 0x1b3   :  { %v331_v26 = vmul.f32 0.5, %v328_v25  ;;  %v329_v27 = vand.u32 2147483647, %v328_v25 }
 0x1b4   :  { %v82_v47 = vsub.f32 1.0, %v81_v45 }
 0x1b5   :  { %v332_v29 = vmul.f32 %v331_v26, %v328_v25  ;;  %v406_v31 = vadd.f32 -0.25, %v329_v27  ;;  %vm330_vm9 = vcmp.lt.f32.partialorder %v329_v27, 0.5 }
 0x1b6   :  { %v83_v52 = vmul.f32 %v460_v43, %v82_v47 }
 0x1b7   :  { %v333_v30 = vmul.f32 %v332_v29, %v546_v17 }
 0x1b8   :  { %v84_v56 = vadd.f32 %v460_v43, %v83_v52 }
 0x1b9   :  { %v335_v32 = vsel %vm330_vm9, %v333_v30, %v406_v31 }
 0x1ba   :  { %v340_v33 = vmul.f32 %v338_v16, %v335_v32  ;;  %v86_v60 = vsel %vm85_vm10, %v460_v43, %v84_v56 }
 0x1bc   :  { %342 = vrot.lane.b32.xlu2 %v340_v33, %s515_s21 }
 0x1c3   :  { %v165_v34 = vpop.permute.xlu2 %164 }
 0x1c4   :  { %v167_v35 = vsel %vm69_vm1, %v165_v34, 0.0 }
 0x1c5   :  { %168 = vadd.xlane.f32.xlu0 %v167_v35 }
 0x1cb   :  { %v257_v36 = vpop.permute.xlu2 %256 }
 0x1cc   :  { %v259_v37 = vsel %vm43_vm3, %v257_v36, 0.0 }
 0x1cd   :  { %260 = vadd.xlane.f32.xlu0 %v259_v37 }
 0x1d2   :  { %v205_v0 = vpop.permute.xlu1 %204 }
 0x1d3   :  { %v207_v38 = vsel %vm69_vm1, %v205_v0, 0.0 }
 0x1d4   :  { %208 = vadd.xlane.f32.xlu1 %v207_v38 }
 0x1e1   :  { %v124_v39 = vpop.permute.xlu0 %123 }
 0x1e2   :  { %v126_v42 = vsel %vm69_vm1, %v124_v39, 0.0 }
 0x1e9   :  { %v235_v17 = vpop.permute.xlu0 %234 }
 0x1ea   :  { %v237_v40 = vsel %vm43_vm3, %v235_v17, 0.0 }
 0x1eb   :  { %238 = vadd.xlane.f32.xlu2 %v237_v40 }
 0x1f3   :  { %127 = vadd.xlane.f32.xlu2 %v126_v42 }
 0x1fd   :  { %v72_v48 = vpop.xlane.xlu1 %71 }
 0x1fe   :  { %v73_v50 = vrot.slane %v72_v48, 4 }
 0x200   :  { %v74_v51 = vadd.f32 %v73_v50, %v72_v48 }
 0x202   :  { %v75_v53 = vrot.slane %v74_v51, 2 }
 0x204   :  { %v76_v55 = vadd.f32 %v75_v53, %v74_v51 }
 0x206   :  { %v77_v57 = vrot.slane %v76_v55, 1 }
 0x208   :  { %v78_v59 = vadd.f32 %v77_v57, %v76_v55 }
 0x20a   :  { %411 = vpush %v78_v59 }
 0x20b   :  { %413 = vpush %v86_v60 }
 0x20c   :  { %415 = vpush %v103_v61 }
 0x215   :  { %v295_v28 = vpop.permute.xlu1 %294 }
 0x216   :  { %v343_v62 = vpop.permute.xlu2 %342  ;;  %v297_v63 = vsel %vm69_vm1, %v295_v28, 0.0 }
 0x217   :  { %298 = vadd.xlane.f32.xlu1 %v297_v63  ;;  %v345_v1 = vsel %vm69_vm1, %v343_v62, 0.0 }
 0x218   :  { %346 = vadd.xlane.f32.xlu2 %v345_v1 }
 0x238   :  { %v169_v4 = vpop.xlane.xlu0 %168 }
 0x239   :  { %v170_v8 = vrot.slane %v169_v4, 4 }
 0x23b   :  { %s412_s22 = spop %411  ;;  %v171_v2 = vadd.f32 %v170_v8, %v169_v4 }
 0x23c   :  { %s591_s23 = spop %413 }
 0x23d   :  { %s88_s24 = smul.f32 %s591_s23, %s412_s22  ;;  %s416_s26 = spop %415  ;;  %v172_v20 = vrot.slane %v171_v2, 2 }
 0x23e   :  { %s105_s28 = smax.f32 %s517_s27, %s416_s26 }
 0x23f   :  { %s368_s25 = smul.f32 8.0, %s88_s24  ;;  %v136_v3 = vstv %s105_s28  ;;  %v173_v29 = vadd.f32 %v172_v20, %v171_v2 }
 0x240   :  { %461 = vrcp.f32 %v136_v3  ;;  %v261_v9 = vpop.xlane.xlu0 %260  ;;  %v148_v33 = vand.u32 2147483648, %v136_v3  ;;  %vm142_vm12 = vweird.f32 %v136_v3  ;;  %v146_v36 = vand.u32 2147483647, %v136_v3 }
 0x241   :  { %370 = sst [smem:[#allocation5 + $0x1]] %s368_s25  ;;  %v262_v13 = vrot.slane %v261_v9, 4  ;;  %v174_v0 = vrot.slane %v173_v29, 1  ;;  %s518_s25 = smov [#allocation5]  }
 0x242   :  { %v149_v40 = vor.u32 1.1754944e-38, %v148_v33  ;;  %vm147_vm14 = vcmp.eq.f32.partialorder %v146_v36, 8.507059e+37 }
 0x243   :  { %v263_v18 = vadd.f32 %v262_v13, %v261_v9  ;;  %v175_v44 = vadd.f32 %v174_v0, %v173_v29 }
 0x245   :  { %v264_v26 = vrot.slane %v263_v18, 2 }
 0x246   :  { %v462_v5 = vpop.eup %461 }
 0x247   :  { %v209_v6 = vpop.xlane.xlu1 %208  ;;  %v138_v10 = vmul.f32 %v462_v5, %v136_v3  ;;  %vm143_vm11 = vweird.f32 %v462_v5  ;;  %v265_v35 = vadd.f32 %v264_v26, %v263_v18 }
 0x248   :  { %v210_v11 = vrot.slane %v209_v6, 4  ;;  %vm144_vm13 = vmor %vm142_vm12, %vm143_vm11 }
 0x249   :  { %v139_v14 = vsub.f32 1.0, %v138_v10  ;;  %v266_v42 = vrot.slane %v265_v35, 1 }
 0x24a   :  { %v211_v15 = vadd.f32 %v210_v11, %v209_v6 }
 0x24b   :  { %v140_v23 = vmul.f32 %v462_v5, %v139_v14  ;;  %v267_v47 = vadd.f32 %v266_v42, %v265_v35 }
 0x24c   :  { %v212_v22 = vrot.slane %v211_v15, 2 }
 0x24d   :  { %v141_v30 = vadd.f32 %v462_v5, %v140_v23 }
 0x24e   :  { %v213_v31 = vadd.f32 %v212_v22, %v211_v15 }
 0x24f   :  { %v145_v38 = vsel %vm144_vm13, %v462_v5, %v141_v30 }
 0x250   :  { %v214_v39 = vrot.slane %v213_v31, 1  ;;  %v150_v43 = vsel %vm147_vm14, %v149_v40, %v145_v38 }
 0x252   :  { %v215_v45 = vadd.f32 %v214_v39, %v213_v31 }
 0x25e   :  { %v239_v7 = vpop.xlane.xlu2 %238 }
 0x25f   :  { %v240_v12 = vrot.slane %v239_v7, 4 }
 0x261   :  { %v241_v16 = vadd.f32 %v240_v12, %v239_v7 }
 0x263   :  { %v242_v24 = vrot.slane %v241_v16, 2 }
 0x265   :  { %v243_v34 = vadd.f32 %v242_v24, %v241_v16 }
 0x266   :  { %v128_v19 = vpop.xlane.xlu2 %127 }
 0x267   :  { %v129_v21 = vrot.slane %v128_v19, 4  ;;  %v244_v41 = vrot.slane %v243_v34, 1 }
 0x269   :  { %v130_v25 = vadd.f32 %v129_v21, %v128_v19  ;;  %v245_v46 = vadd.f32 %v244_v41, %v243_v34 }
 0x26b   :  { %v131_v27 = vrot.slane %v130_v25, 2 }
 0x26d   :  { %v132_v32 = vadd.f32 %v131_v27, %v130_v25 }
 0x26f   :  { %v133_v37 = vrot.slane %v132_v32, 1 }
 0x271   :  { %v134_v17 = vadd.f32 %v133_v37, %v132_v32 }
 0x273   :  { %417 = vpush %v134_v17 }
 0x274   :  { %419 = vpush %v150_v43 }
 0x275   :  { %421 = vpush %v175_v44 }
 0x276   :  { %423 = vpush %v215_v45 }
 0x277   :  { %425 = vpush %v245_v46 }
 0x278   :  { %427 = vpush %v267_v47 }
 0x28a   :  { %v299_v48 = vpop.xlane.xlu1 %298 }
 0x28b   :  { %v300_v49 = vrot.slane %v299_v48, 4  ;;  %v347_v50 = vpop.xlane.xlu2 %346 }
 0x28c   :  { %v348_v51 = vrot.slane %v347_v50, 4 }
 0x28d   :  { %v301_v52 = vadd.f32 %v300_v49, %v299_v48 }
 0x28e   :  { %v349_v53 = vadd.f32 %v348_v51, %v347_v50 }
 0x28f   :  { %v302_v54 = vrot.slane %v301_v52, 2 }
 0x290   :  { %v350_v55 = vrot.slane %v349_v53, 2 }
 0x291   :  { %v303_v56 = vadd.f32 %v302_v54, %v301_v52 }
 0x292   :  { %v351_v57 = vadd.f32 %v350_v55, %v349_v53 }
 0x293   :  { %v304_v58 = vrot.slane %v303_v56, 1 }
 0x294   :  { %v352_v59 = vrot.slane %v351_v57, 1 }
 0x295   :  { %v305_v60 = vadd.f32 %v304_v58, %v303_v56 }
 0x296   :  { %v353_v61 = vadd.f32 %v352_v59, %v351_v57 }
 0x297   :  { %429 = vpush %v305_v60 }
 0x298   :  { %431 = vpush %v353_v61 }
 0x2a4   :  { %s418_s29 = spop %417 }
 0x2a5   :  { %s420_s30 = spop %419 }
 0x2a6   :  { %s152_s2 = smul.f32 %s420_s30, %s418_s29  ;;  %s422_s3 = spop %421 }
 0x2a7   :  { %s193_s4 = smul.f32 %s422_s3, %s420_s30  ;;  %s424_s5 = spop %423 }
 0x2a8   :  { %s371_s6 = smul.f32 8.0, %s152_s2  ;;  %s426_s7 = spop %425 }
 0x2a9   :  { %s374_s8 = smul.f32 8.0, %s193_s4  ;;  %s428_s9 = spop %427 }
 0x2aa   :  { %373 = sst [smem:[#allocation5 + $0x2]] %s371_s6  ;;  %s233_s10 = smul.f32 %s424_s5, %s420_s30 }
 0x2ab   :  { %376 = sst [smem:[#allocation5 + $0x3]] %s374_s8  ;;  %s255_s11 = smul.f32 %s426_s7, %s566_s15 }
 0x2ac   :  { %s377_s12 = smul.f32 4.0, %s233_s10 }
 0x2ad   :  { %s380_s0 = smul.f32 8.0, %s255_s11 }
 0x2ae   :  { %379 = sst [smem:[#allocation5 + $0x4]] %s377_s12  ;;  %s277_s13 = smul.f32 %s428_s9, %s566_s15 }
 0x2af   :  { %382 = sst [smem:[#allocation5 + $0x5]] %s380_s0 }
 0x2b0   :  { %s383_s14 = smul.f32 8.0, %s277_s13 }
 0x2b2   :  { %385 = sst [smem:[#allocation5 + $0x6]] %s383_s14 }
 0x2c8   :  { %s430_s16 = spop %429 }
 0x2c9   :  { %s315_s20 = smul.f32 %s430_s16, %s591_s23  ;;  %s432_s21 = spop %431 }
 0x2ca   :  { %s363_s22 = smul.f32 %s432_s21, %s591_s23 }
 0x2cc   :  { %s364_s24 = sadd.f32 %s363_s22, %s315_s20 }
 0x2ce   :  { %387 = sst [smem:[#allocation5 + $0x7]] %s364_s24 }
 0x2cf   :  { %396 = dma.smem_to_hbm %s518_s25, 16, %s394_s19, [#allocation4]  }
 0x2d0   :  { %501 = dma.done.wait [#allocation4], 16  }
 0x2d1   :  { %502 = vsyncadd [#allocation4], 4294967280 }
 0x2d2   :  { %401 = sfence }
 0x2d3   :  { %402 = vsyncpa [#allocation3], 1 }
 0x2d4   :  { %403 = vsyncpa [#allocation4], 1 }

</bundles_post_ra>
